<compile_context>
chip_gen: v7x
topology: tpu7x:2x2x1
jax: 0.10.0
libtpu: 0.0.40
codegen_flags: <defaults>
</compile_context>

<pallas_src>
import functools

import jax
import jax.numpy as jnp
from jax import lax
from jax.experimental import pallas as pl
from jax.experimental.pallas import tpu as pltpu

LANE = 128
SUBLANE = 8
NUM_CORES = 2              # v7x megacore; extra grid value is harmless on 1-TC chips
DEFAULT_TILE_ROWS = 8192   # (8192, 128) f32 block = 4 MiB per operand per buffer


def _masked_l1_kernel(x_ref, y_ref, m_ref, abs_ref, cnt_ref, *, rows_valid, steps):
    c = pl.program_id(0)          # core / parallel axis
    i = pl.program_id(1)          # reduction axis (sequential per core)
    tr = x_ref.shape[0]

    b = c * steps + i             # logical row-block index
    block_lo = b * tr
    block_hi = block_lo + tr

    # Per-core accumulator outputs live resident in VMEM across the i axis.
    @pl.when(i == 0)
    def _():
        abs_ref[...] = jnp.zeros_like(abs_ref)
        cnt_ref[...] = jnp.zeros_like(cnt_ref)

    # Cast in-kernel (VPU work hidden under DMA); inputs stay native in HBM.
    x = x_ref[...].astype(jnp.float32)
    y = y_ref[...].astype(jnp.float32)
    w = 1.0 - m_ref[...].astype(jnp.float32)
    diff = jnp.abs((x - y) * w)   # == |x*w - y*w| (exact up to fp rounding)

    def accumulate(d, wv):
        # Lane-dense accumulation: only a sublane-axis reduce per block; the
        # cross-lane reduce + divide happen once, outside the kernel.
        abs_ref[0] += jnp.sum(d, axis=0, keepdims=True)
        cnt_ref[0] += jnp.sum(wv, axis=0, keepdims=True)

    # Fast path: block fully inside the valid rows (no per-element masking).
    @pl.when(block_hi <= rows_valid)
    def _():
        accumulate(diff, w)

    # Slow path: the (at most one) block straddling the valid-row boundary.
    # Row-level compare only -> cheap and safe for very large tensors.
    @pl.when((block_lo < rows_valid) & (block_hi > rows_valid))
    def _():
        row = lax.broadcasted_iota(jnp.int32, (tr, LANE), 0)
        valid = (block_lo + row) < rows_valid
        accumulate(jnp.where(valid, diff, 0.0), jnp.where(valid, w, 0.0))
    # Blocks entirely past the valid rows (trailing steps of core 1, at most
    # one per call) contribute nothing; their output blocks stay zero.


def _masked_l1_sums_jnp(x, y, m):
    w = 1.0 - m.astype(jnp.float32)
    d = jnp.abs((x.astype(jnp.float32) - y.astype(jnp.float32)) * w)
    return jnp.sum(d), jnp.sum(w)


def complete_frames_recon_loss(outputs, targets, masks, *, tile_rows=DEFAULT_TILE_ROWS):
    """Pallas equivalent of CompleteFramesReconLoss.forward."""
    assert outputs.shape == targets.shape == masks.shape
    n = outputs.size

    x_flat = outputs.reshape(-1)
    y_flat = targets.reshape(-1)
    m_flat = masks.reshape(-1)

    rows = n // LANE
    n_main = rows * LANE

    tail = None
    if n_main != n:
        # TODO(synk): numel % 128 != 0 -> the <128-element tail is reduced in
        # plain jnp; slicing the main body below costs one extra operand copy.
        tail = _masked_l1_sums_jnp(x_flat[n_main:], y_flat[n_main:], m_flat[n_main:])

    if rows == 0:   # everything fit in the tail
        return tail[0] / tail[1]

    def to_slab(flat):
        if n_main != n:
            flat = flat[:n_main]
        return flat.reshape(rows, LANE)   # free bitcast reshape when n % 128 == 0

    x, y, m = to_slab(x_flat), to_slab(y_flat), to_slab(m_flat)

    if rows >= tile_rows:
        tr = max(32, (tile_rows // 32) * 32)   # multiple of 32: int8/bool mask tiling
    else:
        tr = rows                               # single full-extent block
    nb = pl.cdiv(rows, tr)                      # number of valid row-blocks
    steps = pl.cdiv(nb, NUM_CORES)
    grid = (NUM_CORES, steps)

    def in_map(c, i):
        # Clamp so trailing (invalid) steps never index past the array; their
        # contribution is gated off inside the kernel.
        return (jnp.minimum(c * steps + i, nb - 1), 0)

    in_spec = pl.BlockSpec((tr, LANE), in_map)
    out_spec = pl.BlockSpec((1, 1, LANE), lambda c, i: (c, 0, 0))

    kernel = functools.partial(_masked_l1_kernel, rows_valid=rows, steps=steps)

    out_abs, out_cnt = pl.pallas_call(
        kernel,
        out_shape=(jax.ShapeDtypeStruct((NUM_CORES, 1, LANE), jnp.float32),
                   jax.ShapeDtypeStruct((NUM_CORES, 1, LANE), jnp.float32)),
        grid_spec=pltpu.PrefetchScalarGridSpec(
            num_scalar_prefetch=0,
            grid=grid,
            in_specs=[in_spec, in_spec, in_spec],
            out_specs=[out_spec, out_spec],
        ),
        compiler_params=pltpu.CompilerParams(
            dimension_semantics=("parallel", "arbitrary"),
            vmem_limit_bytes=32 * 1024 * 1024,
        ),
    )(x, y, m)

    abs_sum = jnp.sum(out_abs)
    cnt_sum = jnp.sum(out_cnt)
    if tail is not None:
        abs_sum = abs_sum + tail[0]
        cnt_sum = cnt_sum + tail[1]
    # Note: sum(1 - mask) == 0 yields NaN/Inf, matching the PyTorch reference.
    return abs_sum / cnt_sum


def _reference(outputs, targets, masks):
    masked = 1.0 - masks.astype(jnp.float32)
    xw = outputs.astype(jnp.float32) * masked
    yw = targets.astype(jnp.float32) * masked
    return jnp.sum(jnp.abs(xw - yw)) / jnp.sum(masked)


if __name__ == "__main__":
    key = jax.random.PRNGKey(0)
    k1, k2, k3 = jax.random.split(key, 3)

    # Small shapes consistent with the module (video frames, NCHW-style).
    shape = (2, 4, 16, 16)
    outputs = jax.random.normal(k1, shape, dtype=jnp.float32)
    targets = jax.random.normal(k2, shape, dtype=jnp.float32)
    # Mask kept narrow (int8): the kernel widens it in VMEM, saving HBM BW.
    masks = jax.random.bernoulli(k3, p=0.5, shape=shape).astype(jnp.int8)

    loss = complete_frames_recon_loss(outputs, targets, masks)
    loss = jax.block_until_ready(loss)

    ref = _reference(outputs, targets, masks)
    assert jnp.allclose(loss, ref, rtol=1e-5, atol=1e-5), (loss, ref)

    print("KERNEL_OK")
</pallas_src>

<mosaic_0001>
module attributes {stable_mosaic.version = 11 : i64} {
  func.func @_masked_l1_kernel(%arg0: i32, %arg1: i32, %arg2: memref<16x128xf32, #tpu.memory_space<vmem>>, %arg3: memref<16x128xf32, #tpu.memory_space<vmem>>, %arg4: memref<16x128xi8, #tpu.memory_space<vmem>>, %arg5: memref<1x1x128xf32, #tpu.memory_space<vmem>>, %arg6: memref<1x1x128xf32, #tpu.memory_space<vmem>>) attributes {dimension_semantics = [#tpu.dimension_semantics<parallel>, #tpu.dimension_semantics<arbitrary>], iteration_bounds = array<i64: 2, 1>, scalar_prefetch = 0 : i64, scratch_operands = 0 : i64, tpu.core_type = #tpu.core_type<tc>, window_params = [{transform_indices = @transform_0, window_bounds = array<i64: 16, 128>}, {transform_indices = @transform_1, window_bounds = array<i64: 16, 128>}, {transform_indices = @transform_2, window_bounds = array<i64: 16, 128>}, {transform_indices = @transform_3, window_bounds = array<i64: 1, 1, 128>}, {transform_indices = @transform_4, window_bounds = array<i64: 1, 1, 128>}]} {
    %c1_i32 = arith.constant 1 : i32
    %0 = arith.muli %arg0, %c1_i32 : i32
    %1 = arith.addi %0, %arg1 : i32
    %c16_i32 = arith.constant 16 : i32
    %2 = arith.muli %1, %c16_i32 : i32
    %c16_i32_0 = arith.constant 16 : i32
    %3 = arith.addi %2, %c16_i32_0 : i32
    %c0_i32 = arith.constant 0 : i32
    %4 = arith.cmpi eq, %arg1, %c0_i32 : i32
    %5 = arith.extui %4 : i1 to i32
    %c0_i32_1 = arith.constant 0 : i32
    %6 = arith.cmpi ne, %5, %c0_i32_1 : i32
    scf.if %6 {
      %cst_12 = arith.constant 0.000000e+00 : f32
      %24 = vector.broadcast %cst_12 : f32 to vector<1x1x128xf32>
      %c0_13 = arith.constant 0 : index
      %c0_14 = arith.constant 0 : index
      %c0_15 = arith.constant 0 : index
      %25 = vector.load %arg5[%c0_13, %c0_14, %c0_15] : memref<1x1x128xf32, #tpu.memory_space<vmem>>, vector<1x1x128xf32>
      tpu.vector_store %arg5[%c0_13, %c0_14, %c0_15], %24 {strides = array<i32>} : memref<1x1x128xf32, #tpu.memory_space<vmem>>, vector<1x1x128xf32>,
      %cst_16 = arith.constant 0.000000e+00 : f32
      %26 = vector.broadcast %cst_16 : f32 to vector<1x1x128xf32>
      %c0_17 = arith.constant 0 : index
      %c0_18 = arith.constant 0 : index
      %c0_19 = arith.constant 0 : index
      %27 = vector.load %arg6[%c0_17, %c0_18, %c0_19] : memref<1x1x128xf32, #tpu.memory_space<vmem>>, vector<1x1x128xf32>
      tpu.vector_store %arg6[%c0_17, %c0_18, %c0_19], %26 {strides = array<i32>} : memref<1x1x128xf32, #tpu.memory_space<vmem>>, vector<1x1x128xf32>,
    } else {
    }
    %c0 = arith.constant 0 : index
    %c0_2 = arith.constant 0 : index
    %7 = vector.load %arg2[%c0, %c0_2] : memref<16x128xf32, #tpu.memory_space<vmem>>, vector<16x128xf32>
    %c0_3 = arith.constant 0 : index
    %c0_4 = arith.constant 0 : index
    %8 = vector.load %arg3[%c0_3, %c0_4] : memref<16x128xf32, #tpu.memory_space<vmem>>, vector<16x128xf32>
    %c0_5 = arith.constant 0 : index
    %c0_6 = arith.constant 0 : index
    %9 = vector.load %arg4[%c0_5, %c0_6] : memref<16x128xi8, #tpu.memory_space<vmem>>, vector<16x128xi8>
    %10 = arith.sitofp %9 : vector<16x128xi8> to vector<16x128xf32>
    %cst = arith.constant 1.000000e+00 : f32
    %11 = vector.broadcast %cst : f32 to vector<16x128xf32>
    %12 = arith.subf %11, %10 : vector<16x128xf32>
    %13 = arith.subf %7, %8 : vector<16x128xf32>
    %14 = arith.mulf %13, %12 : vector<16x128xf32>
    %15 = math.absf %14 : vector<16x128xf32>
    %c16_i32_7 = arith.constant 16 : i32
    %16 = arith.cmpi sle, %3, %c16_i32_7 : i32
    %17 = arith.extui %16 : i1 to i32
    %c0_i32_8 = arith.constant 0 : i32
    %18 = arith.cmpi ne, %17, %c0_i32_8 : i32
    scf.if %18 {
      %c0_12 = arith.constant 0 : index
      %c0_13 = arith.constant 0 : index
      %c0_14 = arith.constant 0 : index
      %24 = vector.load %arg5[%c0_12, %c0_13, %c0_14] : memref<1x1x128xf32, #tpu.memory_space<vmem>>, vector<1x1x128xf32>
      %25 = vector.shape_cast %24 : vector<1x1x128xf32> to vector<1x128xf32>
      %cst_15 = arith.constant dense<0.000000e+00> : vector<128xf32>
      %26 = vector.multi_reduction <add>, %15, %cst_15 [0] : vector<16x128xf32> to vector<128xf32>
      %27 = vector.shape_cast %26 : vector<128xf32> to vector<1x128xf32>
      %28 = arith.addf %25, %27 : vector<1x128xf32>
      %c0_16 = arith.constant 0 : index
      %c0_17 = arith.constant 0 : index
      %c0_18 = arith.constant 0 : index
      %29 = vector.load %arg5[%c0_16, %c0_17, %c0_18] : memref<1x1x128xf32, #tpu.memory_space<vmem>>, vector<1x1x128xf32>
      %30 = vector.shape_cast %29 : vector<1x1x128xf32> to vector<1x128xf32>
      %31 = vector.shape_cast %28 : vector<1x128xf32> to vector<1x1x128xf32>
      tpu.vector_store %arg5[%c0_16, %c0_17, %c0_18], %31 {strides = array<i32>} : memref<1x1x128xf32, #tpu.memory_space<vmem>>, vector<1x1x128xf32>,
      %c0_19 = arith.constant 0 : index
      %c0_20 = arith.constant 0 : index
      %c0_21 = arith.constant 0 : index
      %32 = vector.load %arg6[%c0_19, %c0_20, %c0_21] : memref<1x1x128xf32, #tpu.memory_space<vmem>>, vector<1x1x128xf32>
      %33 = vector.shape_cast %32 : vector<1x1x128xf32> to vector<1x128xf32>
      %cst_22 = arith.constant dense<0.000000e+00> : vector<128xf32>
      %34 = vector.multi_reduction <add>, %12, %cst_22 [0] : vector<16x128xf32> to vector<128xf32>
      %35 = vector.shape_cast %34 : vector<128xf32> to vector<1x128xf32>
      %36 = arith.addf %33, %35 : vector<1x128xf32>
      %c0_23 = arith.constant 0 : index
      %c0_24 = arith.constant 0 : index
      %c0_25 = arith.constant 0 : index
      %37 = vector.load %arg6[%c0_23, %c0_24, %c0_25] : memref<1x1x128xf32, #tpu.memory_space<vmem>>, vector<1x1x128xf32>
      %38 = vector.shape_cast %37 : vector<1x1x128xf32> to vector<1x128xf32>
      %39 = vector.shape_cast %36 : vector<1x128xf32> to vector<1x1x128xf32>
      tpu.vector_store %arg6[%c0_23, %c0_24, %c0_25], %39 {strides = array<i32>} : memref<1x1x128xf32, #tpu.memory_space<vmem>>, vector<1x1x128xf32>,
    } else {
    }
    %c16_i32_9 = arith.constant 16 : i32
    %19 = arith.cmpi slt, %2, %c16_i32_9 : i32
    %c16_i32_10 = arith.constant 16 : i32
    %20 = arith.cmpi sgt, %3, %c16_i32_10 : i32
    %21 = arith.andi %19, %20 : i1
    %22 = arith.extui %21 : i1 to i32
    %c0_i32_11 = arith.constant 0 : i32
    %23 = arith.cmpi ne, %22, %c0_i32_11 : i32
    scf.if %23 {
      %24 = tpu.iota {dimensions = array<i32: 0>} : vector<16x128xi32>
      %25 = vector.broadcast %2 : i32 to vector<16x128xi32>
      %26 = arith.addi %25, %24 : vector<16x128xi32>
      %c16_i32_12 = arith.constant 16 : i32
      %27 = vector.broadcast %c16_i32_12 : i32 to vector<16x128xi32>
      %28 = arith.cmpi slt, %26, %27 : vector<16x128xi32>
      %cst_13 = arith.constant 0.000000e+00 : f32
      %29 = vector.broadcast %cst_13 : f32 to vector<16x128xf32>
      %30 = arith.select %28, %15, %29 : vector<16x128xi1>, vector<16x128xf32>
      %cst_14 = arith.constant 0.000000e+00 : f32
      %31 = vector.broadcast %cst_14 : f32 to vector<16x128xf32>
      %32 = arith.select %28, %12, %31 : vector<16x128xi1>, vector<16x128xf32>
      %c0_15 = arith.constant 0 : index
      %c0_16 = arith.constant 0 : index
      %c0_17 = arith.constant 0 : index
      %33 = vector.load %arg5[%c0_15, %c0_16, %c0_17] : memref<1x1x128xf32, #tpu.memory_space<vmem>>, vector<1x1x128xf32>
      %34 = vector.shape_cast %33 : vector<1x1x128xf32> to vector<1x128xf32>
      %cst_18 = arith.constant dense<0.000000e+00> : vector<128xf32>
      %35 = vector.multi_reduction <add>, %30, %cst_18 [0] : vector<16x128xf32> to vector<128xf32>
      %36 = vector.shape_cast %35 : vector<128xf32> to vector<1x128xf32>
      %37 = arith.addf %34, %36 : vector<1x128xf32>
      %c0_19 = arith.constant 0 : index
      %c0_20 = arith.constant 0 : index
      %c0_21 = arith.constant 0 : index
      %38 = vector.load %arg5[%c0_19, %c0_20, %c0_21] : memref<1x1x128xf32, #tpu.memory_space<vmem>>, vector<1x1x128xf32>
      %39 = vector.shape_cast %38 : vector<1x1x128xf32> to vector<1x128xf32>
      %40 = vector.shape_cast %37 : vector<1x128xf32> to vector<1x1x128xf32>
      tpu.vector_store %arg5[%c0_19, %c0_20, %c0_21], %40 {strides = array<i32>} : memref<1x1x128xf32, #tpu.memory_space<vmem>>, vector<1x1x128xf32>,
      %c0_22 = arith.constant 0 : index
      %c0_23 = arith.constant 0 : index
      %c0_24 = arith.constant 0 : index
      %41 = vector.load %arg6[%c0_22, %c0_23, %c0_24] : memref<1x1x128xf32, #tpu.memory_space<vmem>>, vector<1x1x128xf32>
      %42 = vector.shape_cast %41 : vector<1x1x128xf32> to vector<1x128xf32>
      %cst_25 = arith.constant dense<0.000000e+00> : vector<128xf32>
      %43 = vector.multi_reduction <add>, %32, %cst_25 [0] : vector<16x128xf32> to vector<128xf32>
      %44 = vector.shape_cast %43 : vector<128xf32> to vector<1x128xf32>
      %45 = arith.addf %42, %44 : vector<1x128xf32>
      %c0_26 = arith.constant 0 : index
      %c0_27 = arith.constant 0 : index
      %c0_28 = arith.constant 0 : index
      %46 = vector.load %arg6[%c0_26, %c0_27, %c0_28] : memref<1x1x128xf32, #tpu.memory_space<vmem>>, vector<1x1x128xf32>
      %47 = vector.shape_cast %46 : vector<1x1x128xf32> to vector<1x128xf32>
      %48 = vector.shape_cast %45 : vector<1x128xf32> to vector<1x1x128xf32>
      tpu.vector_store %arg6[%c0_26, %c0_27, %c0_28], %48 {strides = array<i32>} : memref<1x1x128xf32, #tpu.memory_space<vmem>>, vector<1x1x128xf32>,
    } else {
    }
    return
  }
  func.func @transform_0(%arg0: i32, %arg1: i32) -> (i32, i32) {
    %c1_i32 = arith.constant 1 : i32
    %0 = arith.muli %arg0, %c1_i32 : i32
    %1 = arith.addi %0, %arg1 : i32
    %c0_i32 = arith.constant 0 : i32
    %2 = arith.minsi %1, %c0_i32 : i32
    %c0_i32_0 = arith.constant 0 : i32
    %c0_i32_1 = arith.constant 0 : i32
    return %2, %c0_i32_0 : i32, i32
  }
  func.func @transform_1(%arg0: i32, %arg1: i32) -> (i32, i32) {
    %c1_i32 = arith.constant 1 : i32
    %0 = arith.muli %arg0, %c1_i32 : i32
    %1 = arith.addi %0, %arg1 : i32
    %c0_i32 = arith.constant 0 : i32
    %2 = arith.minsi %1, %c0_i32 : i32
    %c0_i32_0 = arith.constant 0 : i32
    %c0_i32_1 = arith.constant 0 : i32
    return %2, %c0_i32_0 : i32, i32
  }
  func.func @transform_2(%arg0: i32, %arg1: i32) -> (i32, i32) {
    %c1_i32 = arith.constant 1 : i32
    %0 = arith.muli %arg0, %c1_i32 : i32
    %1 = arith.addi %0, %arg1 : i32
    %c0_i32 = arith.constant 0 : i32
    %2 = arith.minsi %1, %c0_i32 : i32
    %c0_i32_0 = arith.constant 0 : i32
    %c0_i32_1 = arith.constant 0 : i32
    return %2, %c0_i32_0 : i32, i32
  }
  func.func @transform_3(%arg0: i32, %arg1: i32) -> (i32, i32, i32) {
    %c0_i32 = arith.constant 0 : i32
    %c0_i32_0 = arith.constant 0 : i32
    %c0_i32_1 = arith.constant 0 : i32
    return %arg0, %c0_i32, %c0_i32_0 : i32, i32, i32
  }
  func.func @transform_4(%arg0: i32, %arg1: i32) -> (i32, i32, i32) {
    %c0_i32 = arith.constant 0 : i32
    %c0_i32_0 = arith.constant 0 : i32
    %c0_i32_1 = arith.constant 0 : i32
    return %arg0, %c0_i32, %c0_i32_0 : i32, i32, i32
  }
}

</mosaic_0001>

<bundles_post_ra>
// kernel: tpu_custom_call.1
= control target key start
LH: loop header
LB: loop body
LE: loop exit
PB: predicated region body
PF: predicated region fallthrough
CT: control target
= control target key end

     0   :  { %10 = vsyncpa [#allocation3], 0  ;;  %s1228_s0 = inlined_call_operand.hbm [shape: f32[16,128], index: 0, kind: input, shape index: {}]   ;;  %s1229_s1 = inlined_call_operand.hbm [shape: f32[16,128], index: 1, kind: input, shape index: {}]   ;;  %s1230_s2 = inlined_call_operand.vmem [shape: s8[16,128], index: 2, kind: input, shape index: {}]   ;;  %s1231_s3 = inlined_call_operand.hbm [shape: f32[2,1,128], index: 3, kind: output, shape index: {0}]   ;;  %s1232_s4 = inlined_call_operand.hbm [shape: f32[2,1,128], index: 4, kind: output, shape index: {1}]  }
   0x1   :  { %12 = vsyncpa [#allocation3 + $0x1], 0 }
   0x2   :  { %13 = vsyncpa [#allocation6], 0 }
   0x3   :  { %15 = vsyncpa [#allocation6 + $0x1], 0 }
   0x4   :  { %16 = vsyncpa [#allocation4], 0 }
   0x5   :  { %18 = vsyncpa [#allocation4 + $0x1], 0 }
   0x6   :  { %19 = vsyncpa [#allocation9], 0 }
   0x7   :  { %21 = vsyncpa [#allocation9 + $0x1], 0  ;;  %s961_s15 = smov 0   ;;  %s963_s16 = smov 0  }
   0x8   :  { %s965_s17 = smov 0   ;;  %s967_s18 = smov 0  }
   0x9   :  { %s969_s19 = smov 0   ;;  %s971_s20 = smov 0  }
   0xa   :  { %s973_s21 = smov 0   ;;  %s975_s22 = smov 0  }
   0xb LB: > { %s602_s23 = sadd.s32 4294967295, %s927_s22   ;;  %s603_s24 = sadd.s32 4294967294, %s927_s22   ;;  %s927_s22 = sphi %s975_s22, %s27_s22   ;;  %s923_s21 = sphi %s973_s21, %s1252_s21   ;;  %s919_s20 = sphi %s971_s20, %s1251_s20   ;;  %s915_s19 = sphi %s969_s19, %s1218_s19   ;;  %s911_s18 = sphi %s967_s18, %s1250_s18   ;;  %s907_s17 = sphi %s965_s17, %s1249_s17   ;;  %s903_s16 = sphi %s963_s16, %s1248_s16   ;;  %s899_s15 = sphi %s961_s15, %s1247_s15  }
   0xc   : > { %s39_s25 = sadd.s32 1, %s923_s21  ;;  %p896_p1 = scmp.ne.s32.totalorder %s915_s19, 0 }
   0xd   : > { %p41_p0 = scmp.ge.s32.totalorder %s39_s25, 2  ;;  %p60_p2 = scmp.eq.s32.totalorder %s927_s22, 0 }
   0xe   : > { %p65_p3 = scmp.ne.s32.totalorder %s915_s19, %s911_s18  ;;  %p66_p5 = scmp.eq.s32.totalorder %s602_s23, 0 }
   0xf   : > { %s1254_s25 = smov (%p41_p0, %s39_s25), 0  ;;  %p1007_p4 = por %p896_p1, %p60_p2 }
  0x10   : > { %p1011_p6 = por %p66_p5, %p65_p3  ;;  %s139_s28 = ssub.s32 %s923_s21, %s1254_s25 }
  0x11   : > { %p140_p7 = scmp.eq.s32.totalorder %s139_s28, 0  ;;  %s142_s29 = sadd.s32 1, %s907_s17 }
  0x12   : > { %s1236_s27 = scalar_select %p1011_p6, 1, 0 }
  0x13   : > { %s1019_s30 = scalar_select %p140_p7, %s907_s17, %s142_s29  }
  0x14   : > { %p152_p8 = scmp.ne.s32.totalorder %s907_s17, %s903_s16  ;;  %p153_p9 = scmp.eq.s32.totalorder %s602_s23, 1 }
  0x15   : > { %p158_p10 = scmp.ne.s32.totalorder %s903_s16, %s899_s15  ;;  %p159_p11 = scmp.eq.s32.totalorder %s603_s24, 1 }
  0x16   : > { %p1025_p12 = por %p153_p9, %p152_p8  ;;  %p651_p1 = scmp.lt.s32.totalorder %s927_s22, 2 }
  0x17   : > { %p1030_p0 = por %p159_p11, %p158_p10  ;;  %s929_s7 = smov [#allocation2]  }
  0x18   : > { %s1237_s5 = scalar_select %p1025_p12, 1, 0 }
  0x19   : > { %s1238_s6 = scalar_select %p1030_p0, 1, 0 }
  0x1a   : > { %s219_s8 = sshll.u32 %s929_s7, 4  ;;  %p1037_p2 = pnand %p651_p1, %p1007_p4  ;;  %s220_s8 = int_to_ptr.vmem [resolvable:$true] %s219_s8 }
  0x1b   : > { %s728_s12 = scalar_lea.hbm %s1228_s0, 256 }
  0x1c   : > { %p729_p3 = scmp.ne.s32.totalorder %s1228_s0, %s728_s12  ;;  %p730_p5 = pneg %p1037_p2 }
  0x1d   : > { %p735_p8 = scmp.lt.u32.totalorder %s728_s12, %s728_s12  ;;  %p737_p9 = scmp.lt.u32.totalorder %s728_s12, %s1228_s0 }
  0x1e   : > { %p731_p7 = pnand %p730_p5, %p729_p3 }
  0x1f   : > { %p738_p10 = por %p737_p9, %p735_p8 }
  0x20   : > { %p732_p4 = pneg %p731_p7 }
  0x22   : > { %p739_p11 = pnand %p738_p10, %p732_p4 }
  0x24   : > { %742 = shalt.err (!%p739_p11)
}
  0x25   : > { %s743_s24 = scalar_lea.vmem %s220_s8, 256  ;;  %s750_s26 = scalar_lea.vmem %s220_s8, 512 }
  0x26   : > { %p744_p1 = scmp.ne.s32.totalorder %s220_s8, %s743_s24  ;;  %p751_p12 = scmp.lt.s32.totalorder %s220_s8, %s220_s8 }
  0x27   : > { %p752_p6 = scmp.lt.s32.totalorder %s750_s26, %s743_s24 }
  0x28   : > { %p746_p13 = pnand %p744_p1, %p730_p5 }
  0x29   : > { %p753_p3 = por %p752_p6, %p751_p12 }
  0x2a   : > { %p747_p0 = pneg %p746_p13 }
  0x2c   : > { %p754_p7 = pnand %p753_p3, %p747_p0 }
  0x2e   : > { %757 = shalt.err (!%p754_p7)
}
  0x2f   : > { %s930_s28 = smov 128   ;;  %s931_s29 = smov 8  }
  0x30   : > { %640 = dma.hbm_to_vmem [thread:$0]  (!%p1037_p2), %s1228_s0, 256, %s220_s8, [#allocation3], %s930_s28, %s930_s28, %s931_s29  }
  0x31   : > { %p612_p13 = scmp.ge.s32.totalorder %s927_s22, 1  ;;  %p266_p4 = scmp.lt.s32.totalorder %s927_s22, 3 }
  0x32   : > { %s932_s12 = smov [#allocation5]   ;;  %s758_s23 = scalar_lea.hbm %s1229_s1, 256 }
  0x33   : > { %p1068_p8 = pnand %p612_p13, %p266_p4  ;;  %s243_s13 = sshll.u32 %s932_s12, 4  ;;  %s244_s13 = int_to_ptr.vmem [resolvable:$true] %s243_s13 }
  0x34   : > { %p759_p6 = scmp.ne.s32.totalorder %s1229_s1, %s758_s23  ;;  %p765_p9 = scmp.lt.u32.totalorder %s758_s23, %s758_s23 }
  0x35   : > { %s1240_s11 = scalar_select %p1068_p8, 1, 0 }
  0x36   : > { %p761_p12 = pnand %p759_p6, %p730_p5  ;;  %p767_p10 = scmp.lt.u32.totalorder %s758_s23, %s1229_s1 }
  0x38   : > { %p762_p0 = pneg %p761_p12  ;;  %p768_p11 = por %p767_p10, %p765_p9 }
  0x3a   : > { %p769_p1 = pnand %p768_p11, %p762_p0 }
  0x3c   : > { %772 = shalt.err (!%p769_p1)
}
  0x3d   : > { %s773_s10 = scalar_lea.vmem %s244_s13, 256  ;;  %s780_s12 = scalar_lea.vmem %s244_s13, 512 }
  0x3e   : > { %p774_p3 = scmp.ne.s32.totalorder %s244_s13, %s773_s10  ;;  %p781_p4 = scmp.lt.s32.totalorder %s244_s13, %s244_s13 }
  0x3f   : > { %p782_p8 = scmp.lt.s32.totalorder %s780_s12, %s773_s10 }
  0x40   : > { %p776_p7 = pnand %p774_p3, %p730_p5 }
  0x41   : > { %p783_p6 = por %p782_p8, %p781_p4 }
  0x42   : > { %p777_p13 = pneg %p776_p7 }
  0x44   : > { %p784_p12 = pnand %p783_p6, %p777_p13 }
  0x46   : > { %787 = shalt.err (!%p784_p12)
}
  0x47   : > { %643 = dma.hbm_to_vmem [thread:$0]  (!%p1037_p2), %s1229_s1, 256, %s244_s13, [#allocation6], %s930_s28, %s930_s28, %s931_s29  }
  0x48   : > { %p1241_p0 = scmp.ne.s32.totalorder %s1240_s11, 0 }
  0x49   : > { %s272_s23 = sand.u32 (!%p1241_p0), 1, %s915_s19   ;;  %p1242_p5 = scmp.ne.s32.totalorder (!%p1241_p0), %s1236_s27, 0 }
  0x4a   : > { %270 = sbr.rel (%p1241_p0) target bundleno = 199 (0xc7), region = 32  ;;  %s613_s24 = sshll.u32 (!%p1241_p0), %s272_s23, 4 }
  0x4b   : > { %s273_s26 = scalar_lea.sflag (!%p1241_p0), [#allocation3], %s272_s23  ;;  %s276_s8 = scalar_lea.vmem (!%p1241_p0), [#allocation2], %s613_s24 }
  0x51   : > { %881 = dma.done.wait (%p1242_p5), %s273_s26, 256  }
  0x52   : > { %883 = vsyncadd (%p1242_p5), %s273_s26, 4294967040  ;;  %s282_s9 = scalar_lea.sflag [#allocation6], %s272_s23  ;;  %s285_s7 = scalar_lea.vmem [#allocation5], %s613_s24 }
  0x53   : > { %885 = dma.done.wait (%p1242_p5), %s282_s9, 256  }
  0x54   : > { %887 = vsyncadd (%p1242_p5), %s282_s9, 4294967040  ;;  %p335_p2 = scmp.lt.s32.totalorder %s919_s20, 0  ;;  %s1108_s28 = sand.u32 1, %s903_s16   ;;  %v933_v0 = vmov 0.0   ;;  %v355_v1 = vld [vmem:[%s276_s8] sm:$0xff]  ;;  %v356_v2 = vld [vmem:[%s276_s8 + $0x8] sm:$0xff] }
  0x55   : > { %s1111_s29 = sshll.u32 %s919_s20, 4  ;;  %s1115_s11 = scalar_lea.vmem [#allocation7], %s1108_s28  ;;  %v357_v3 = vld [vmem:[%s285_s7] sm:$0xff]  ;;  %v358_v4 = vld [vmem:[%s285_s7 + $0x8] sm:$0xff] }
  0x56   : > { %s1256_s20 = smov (!%p335_p2, %s919_s20), 0  ;;  %353 = vst [vmem:[%s1115_s11] sm:$0x1] %v933_v0  ;;  %s348_s27 = sadd.s32 16, %s1111_s29  ;;  %v367_v10 = vsub.f32 %v355_v1, %v357_v3  ;;  %v368_v11 = vsub.f32 %v356_v2, %v358_v4 }
  0x57   : > { %s615_s13 = sshll.u32 %s1256_s20, 1  ;;  %s1120_s10 = scalar_lea.vmem [#allocation8], %s1108_s28 }
  0x58   : > { %354 = vst [vmem:[%s1120_s10] sm:$0x1] %v933_v0  ;;  %p338_p8 = scmp.lt.s32.totalorder %s615_s13, 1  ;;  %p1126_p9 = scmp.gt.s32.totalorder %s348_s27, 16 }
  0x5a   : > { %s1258_s13 = smov (!%p338_p8, %s615_s13), 1 }
  0x5b   : > { %s616_s12 = sshll.u32 %s1258_s13, 1 }
  0x5c   : > { %s341_s23 = scalar_lea.vmem %s1230_s2, %s616_s12 }
  0x5d   : > { %v626_v5 = vld [vmem:[%s341_s23] sm:$0xf]  }
  0x5e   : > { %v627_v6 = vunpack.c.0.s8 %v626_v5  ;;  %v628_v7 = vunpack.c.1.s8 %v626_v5  ;;  %v377_v30 = vld [vmem:[%s1115_s11] sm:$0x1] (!%p1126_p9) }
  0x5f   : > { %v387_v31 = vld [vmem:[%s1120_s10] sm:$0x1] (!%p1126_p9) }
  0x60   : > { %v363_v8 = vcvt.s32.f32 %v627_v6  ;;  %v364_v9 = vcvt.s32.f32 %v628_v7  ;;  %376 = sbr.rel (%p1126_p9) target bundleno = 121 (0x79), region = 48 }
  0x62   : > { %v365_v12 = vsub.f32 1.0, %v363_v8  ;;  %v366_v13 = vsub.f32 1.0, %v364_v9 }
  0x64   : > { %v369_v14 = vmul.f32 %v367_v10, %v365_v12  ;;  %v370_v15 = vmul.f32 %v368_v11, %v366_v13  ;;  %v388_v19 = vadd.f32 (!%p1126_p9), %v366_v13, %v365_v12 }
  0x66   : > { %v371_v16 = vand.u32 2147483647, %v369_v14  ;;  %v372_v17 = vand.u32 2147483647, %v370_v15  ;;  %v389_v21 = vrot.slane (!%p1126_p9), %v388_v19, 4 }
  0x68   : > { %v378_v18 = vadd.f32 %v372_v17, %v371_v16  ;;  %v390_v23 = vadd.f32 %v389_v21, %v388_v19 }
  0x6a   : > { %v379_v20 = vrot.slane %v378_v18, 4  ;;  %v391_v25 = vrot.slane %v390_v23, 2 }
  0x6c   : > { %v380_v22 = vadd.f32 %v379_v20, %v378_v18  ;;  %v392_v27 = vadd.f32 %v391_v25, %v390_v23 }
  0x6e   : > { %v381_v24 = vrot.slane %v380_v22, 2  ;;  %v393_v29 = vrot.slane %v392_v27, 1 }
  0x70   : > { %v382_v26 = vadd.f32 %v381_v24, %v380_v22  ;;  %v394_v33 = vadd.f32 %v393_v29, %v392_v27 }
  0x72   : > { %v383_v28 = vrot.slane %v382_v26, 1  ;;  %v395_v35 = vadd.f32 %v394_v33, %v387_v31 }
  0x74   : > { %v384_v32 = vadd.f32 %v383_v28, %v382_v26  ;;  %396 = vst [vmem:[%s1120_s10] sm:$0x1] %v395_v35 }
  0x76   : > { %v385_v34 = vadd.f32 %v384_v32, %v377_v30 }
  0x78   : > { %386 = vst [vmem:[%s1115_s11] sm:$0x1] %v385_v34 }
  0x79 PF: > { %p397_p10 = scmp.lt.s32.totalorder %s1111_s29, 16 }
  0x7b   : > { %p399_p11 = pnand %p1126_p9, %p397_p10 }
  0x7c   : > { %v403_v36 = vlaneseq (!%p399_p11)  ;;  %v406_v37 = vstv (!%p399_p11), %s1111_s29  ;;  %v425_v59 = vld [vmem:[%s1120_s10] sm:$0x1] (!%p399_p11) }
  0x7d   : > { %402 = sbr.rel (%p399_p11) target bundleno = 151 (0x97), region = 52 }
  0x7e   : > { %v404_v38 = vshrl.u32 (!%p399_p11), %v403_v36, 7 }
  0x7f   : > { %v415_v58 = vld [vmem:[%s1115_s11] sm:$0x1] (!%p399_p11) }
  0x80   : > { %v405_v39 = vadd.s32 (!%p399_p11), 8, %v404_v38  ;;  %v407_v40 = vadd.s32 (!%p399_p11), %v406_v37, %v404_v38 }
  0x82   : > { %v408_v41 = vadd.s32 (!%p399_p11), %v406_v37, %v405_v39  ;;  %vm409_vm0 = vcmp.lt.s32.totalorder (!%p399_p11), %v407_v40, 16 }
  0x83   : > { %v411_v42 = vsel (!%p399_p11), %vm409_vm0, %v371_v16, 0.0  ;;  %v413_v43 = vsel (!%p399_p11), %vm409_vm0, %v365_v12, 0.0 }
  0x84   : > { %vm410_vm1 = vcmp.lt.s32.totalorder %v408_v41, 16 }
  0x85   : > { %v412_v44 = vsel %vm410_vm1, %v372_v17, 0.0  ;;  %v414_v45 = vsel %vm410_vm1, %v366_v13, 0.0 }
  0x86   : > { %v416_v46 = vadd.f32 %v412_v44, %v411_v42  ;;  %v426_v47 = vadd.f32 %v414_v45, %v413_v43 }
  0x88   : > { %v417_v48 = vrot.slane %v416_v46, 4  ;;  %v427_v49 = vrot.slane %v426_v47, 4 }
  0x8a   : > { %v418_v50 = vadd.f32 %v417_v48, %v416_v46  ;;  %v428_v51 = vadd.f32 %v427_v49, %v426_v47 }
  0x8c   : > { %v419_v52 = vrot.slane %v418_v50, 2  ;;  %v429_v53 = vrot.slane %v428_v51, 2 }
  0x8e   : > { %v420_v54 = vadd.f32 %v419_v52, %v418_v50  ;;  %v430_v55 = vadd.f32 %v429_v53, %v428_v51 }
  0x90   : > { %v421_v56 = vrot.slane %v420_v54, 1  ;;  %v431_v57 = vrot.slane %v430_v55, 1 }
  0x92   : > { %v422_v60 = vadd.f32 %v421_v56, %v420_v54  ;;  %v432_v61 = vadd.f32 %v431_v57, %v430_v55 }
  0x94   : > { %v423_v62 = vadd.f32 %v422_v60, %v415_v58  ;;  %v433_v63 = vadd.f32 %v432_v61, %v425_v59 }
  0x96   : > { %424 = vst [vmem:[%s1115_s11] sm:$0x1] %v423_v62  ;;  %434 = vst [vmem:[%s1120_s10] sm:$0x1] %v433_v63 }
  0x97 PF: > { %s1148_s8 = scalar_lea.hbm %s1231_s3, %s1111_s29  ;;  %s452_s9 = sshll.u32 %s1115_s11, 4  ;;  %s1151_s9 = int_to_ptr.vmem [resolvable:$true] %s452_s9 }
  0x98   : > { %s1157_s13 = scalar_lea.hbm %s1232_s4, %s1111_s29  ;;  %s436_s12 = scalar_lea.sflag [#allocation4], %s1108_s28 }
  0x99   : > { %s788_s14 = scalar_lea.vmem %s1151_s9, 16  ;;  %p1244_p3 = scmp.ne.s32.totalorder %s1237_s5, 0 }
  0x9a   : > { %p789_p1 = scmp.ne.s32.totalorder %s1151_s9, %s788_s14  ;;  %s934_s18 = smov [#allocation7]  }
  0x9b   : > { %s792_s23 = sshll.u32 %s934_s18, 4  ;;  %s793_s23 = int_to_ptr.vmem [resolvable:$false] %s792_s23 }
  0x9c   : > { %p790_p7 = pnand %p789_p1, %p1244_p3  ;;  %s794_s11 = scalar_lea.vmem %s793_s23, 32 }
  0x9d   : > { %p795_p4 = scmp.lt.s32.totalorder %s1151_s9, %s793_s23  ;;  %p796_p6 = scmp.lt.s32.totalorder %s794_s11, %s788_s14 }
  0x9e   : > { %p791_p13 = pneg %p790_p7 }
  0x9f   : > { %p797_p12 = por %p796_p6, %p795_p4 }
  0xa1   : > { %p798_p0 = pnand %p797_p12, %p791_p13 }
  0xa3   : > { %801 = shalt.err (!%p798_p0)
}
  0xa4   : > { %s802_s29 = scalar_lea.hbm %s1148_s8, 16  ;;  %s806_s26 = scalar_lea.hbm %s1231_s3, 32 }
  0xa5   : > { %p803_p5 = scmp.ne.s32.totalorder %s1148_s8, %s802_s29  ;;  %p807_p9 = scmp.lt.u32.totalorder %s1148_s8, %s1231_s3 }
  0xa6   : > { %p808_p10 = scmp.lt.u32.totalorder %s806_s26, %s802_s29  ;;  %p810_p1 = scmp.lt.u32.totalorder %s802_s29, %s1148_s8 }
  0xa7   : > { %p804_p2 = pnand %p803_p5, %p1244_p3 }
  0xa8   : > { %p809_p11 = por %p808_p10, %p807_p9 }
  0xa9   : > { %p805_p8 = pneg %p804_p2 }
  0xaa   : > { %p811_p7 = por %p810_p1, %p809_p11 }
  0xac   : > { %p812_p13 = pnand %p811_p7, %p805_p8 }
  0xae   : > { %815 = shalt.err (!%p812_p13)
}
  0xaf   : > { %633 = dma.vmem_to_hbm [thread:$0]  (%p1244_p3), %s1151_s9, 16, %s1148_s8, %s436_s12  }
  0xb0   : > { %s465_s14 = sshll.u32 %s1120_s10, 4  ;;  %s440_s18 = scalar_lea.sflag [#allocation9], %s1108_s28  ;;  %s466_s14 = int_to_ptr.vmem [resolvable:$true] %s465_s14 }
  0xb1   : > { %s816_s23 = scalar_lea.vmem %s466_s14, 16  ;;  %s935_s11 = smov [#allocation8]  }
  0xb2   : > { %p817_p4 = scmp.ne.s32.totalorder %s466_s14, %s816_s23  ;;  %s820_s29 = sshll.u32 %s935_s11, 4  ;;  %s821_s29 = int_to_ptr.vmem [resolvable:$false] %s820_s29 }
  0xb3   : > { %s822_s20 = scalar_lea.vmem %s821_s29, 32  ;;  %p823_p0 = scmp.lt.s32.totalorder %s466_s14, %s821_s29 }
  0xb4   : > { %p818_p6 = pnand %p817_p4, %p1244_p3  ;;  %p824_p5 = scmp.lt.s32.totalorder %s822_s20, %s816_s23 }
  0xb6   : > { %p819_p12 = pneg %p818_p6  ;;  %p825_p2 = por %p824_p5, %p823_p0 }
  0xb8   : > { %p826_p8 = pnand %p825_p2, %p819_p12 }
  0xba   : > { %829 = shalt.err (!%p826_p8)
}
  0xbb   : > { %s830_s28 = scalar_lea.hbm %s1157_s13, 16  ;;  %s834_s9 = scalar_lea.hbm %s1232_s4, 32 }
  0xbc   : > { %p831_p9 = scmp.ne.s32.totalorder %s1157_s13, %s830_s28  ;;  %p835_p1 = scmp.lt.u32.totalorder %s1157_s13, %s1232_s4 }
  0xbd   : > { %p836_p7 = scmp.lt.u32.totalorder %s834_s9, %s830_s28  ;;  %p838_p4 = scmp.lt.u32.totalorder %s830_s28, %s1157_s13 }
  0xbe   : > { %p832_p10 = pnand %p831_p9, %p1244_p3 }
  0xbf   : > { %p837_p13 = por %p836_p7, %p835_p1 }
  0xc0   : > { %p833_p11 = pneg %p832_p10 }
  0xc1   : > { %p839_p6 = por %p838_p4, %p837_p13 }
  0xc3   : > { %p840_p12 = pnand %p839_p6, %p833_p11 }
  0xc5   : > { %843 = shalt.err (!%p840_p12)
}
  0xc6   : > { %634 = dma.vmem_to_hbm [thread:$0]  (%p1244_p3), %s466_s14, 16, %s1157_s13, %s440_s18  }
  0xc7 PF: > { %s477_s26 = sand.u32 1, %s899_s15   ;;  %p1245_p0 = scmp.ne.s32.totalorder %s1238_s6, 0 }
  0xc8   : > { %p1246_p5 = scmp.ge.s32.totalorder %s927_s22, 2  ;;  %s478_s7 = scalar_lea.sflag [#allocation4], %s477_s26 }
  0xca   : > { %p645_p2 = pnand %p1246_p5, %p1245_p0 }
  0xcc   : > { %889 = dma.done.wait (!%p645_p2), %s478_s7, 16  }
  0xcd   : > { %891 = vsyncadd (!%p645_p2), %s478_s7, 4294967280  ;;  %s486_s27 = scalar_lea.sflag [#allocation9], %s477_s26 }
  0xce   : > { %893 = dma.done.wait (!%p645_p2), %s486_s27, 16  }
  0xcf   : > { %895 = vsyncadd (!%p645_p2), %s486_s27, 4294967280  ;;  %s27_s22 = sadd.s32 1, %s927_s22   ;;  %s1247_s15 = smov %s903_s16 }
  0xd0   : > { %p24_p8 = scmp.ge.s32.totalorder %s27_s22, 4   ;;  %s1248_s16 = smov %s907_s17 }
  0xd1   : > { %s1249_s17 = smov %s1019_s30  ;;  %s1250_s18 = smov %s915_s19 }
  0xd2   : > { %s1218_s19 = smov 0   ;;  %s1251_s20 = smov %s923_s21 }
  0xd3   : > { %s1252_s21 = smov %s1254_s25  ;;  %26 = sbr.rel (!%p24_p8) target bundleno = 11 (0xb), region = 122 }
  0xda   :  { %490 = vsyncpa [#allocation3], 1 }
  0xdb   :  { %492 = vsyncpa [#allocation3 + $0x1], 1 }
  0xdc   :  { %493 = vsyncpa [#allocation6], 1 }
  0xdd   :  { %495 = vsyncpa [#allocation6 + $0x1], 1 }
  0xde   :  { %496 = vsyncpa [#allocation4], 1 }
  0xdf   :  { %498 = vsyncpa [#allocation4 + $0x1], 1 }
  0xe0   :  { %499 = vsyncpa [#allocation9], 1 }
  0xe1   :  { %501 = vsyncpa [#allocation9 + $0x1], 1 }

</bundles_post_ra>
